<compile_context>
chip_gen: v7x
topology: tpu7x:2x2x1
jax: 0.10.0
libtpu: 0.0.40
codegen_flags: <defaults>
</compile_context>

<pallas_src>
import functools

import jax
import jax.numpy as jnp
import numpy as np
from jax.experimental import pallas as pl
from jax.experimental.pallas import tpu as pltpu

# ---- module-level constants mirroring the PyTorch script ----
K = 4                      # the external `k` (chosen deterministically)
PARM1 = 4                  # n_channel
R = K / PARM1              # communication rate = 1.0
TRAIN_SNR = 5.01187

LANES = 128                # f32 lane width; everything is padded to this


def _round_up(x, m):
    return ((x + m - 1) // m) * m


def rtn_kernel(act_ref, w_ref, b_ref, out_ref, *, in_channels, compressed_dim):
    """Fused two-user forward on one (TB, 128) activation tile.

    act slab layout (lanes): [ x1 (C) | x2 (C) | noise1 (D) | noise2 (D) | 0 ]
    weight slab w_ref: (4, 128, 128) zero-padded block-diagonal weights
      [0] enc layer1, [1] enc layer2, [2] dec layer1, [3] dec layer2
    bias slab b_ref: (4, 128) matching zero-padded biases.
    out slab layout (lanes): [ decode1 (D) | decode2 (C) | 0 ]
    """
    C = in_channels
    D = compressed_dim

    act = act_ref[...]                     # (TB, 128)
    b = b_ref[...]                         # (4, 128)

    # --- fused encoders: Linear -> Tanh -> Linear (block-diagonal weights).
    # Zero weight rows beyond 2C make the noise lanes in `act` inert.
    h1 = jnp.tanh(
        jnp.dot(act, w_ref[0], preferred_element_type=jnp.float32) + b[0:1, :])
    enc = jnp.dot(h1, w_ref[1], preferred_element_type=jnp.float32) + b[1:2, :]

    # --- per-user L2 normalization, scaled by sqrt(in_channels) ---
    x1e = enc[:, 0:D]
    x2e = enc[:, D:2 * D]
    scale = jnp.float32(C) ** 0.5
    eps = jnp.float32(1e-12)
    inv1 = jax.lax.rsqrt(jnp.sum(x1e * x1e, axis=-1, keepdims=True) + eps)
    inv2 = jax.lax.rsqrt(jnp.sum(x2e * x2e, axis=-1, keepdims=True) + eps)
    x1n = scale * x1e * inv1
    x2n = scale * x2e * inv2

    # --- mixed channel + AWGN (noise precomputed, pre-scaled on host) ---
    n1 = act[:, 2 * C:2 * C + D]
    n2 = act[:, 2 * C + D:2 * C + 2 * D]
    mixed = x1n + x2n
    sig1 = mixed + n1                      # x1 + noise1 + x2
    sig2 = mixed + n2                      # x1 + x2 + noise2

    tb = act.shape[0]
    pad = jnp.zeros((tb, LANES - 2 * D), jnp.float32)
    dec_in = jnp.concatenate([sig1, sig2, pad], axis=-1)   # (TB, 128)

    # --- fused decoders: Linear -> Tanh -> Linear (block-diagonal weights) ---
    h2 = jnp.tanh(
        jnp.dot(dec_in, w_ref[2], preferred_element_type=jnp.float32) + b[2:3, :])
    out_ref[...] = (
        jnp.dot(h2, w_ref[3], preferred_element_type=jnp.float32) + b[3:4, :])


def make_linear_params(key, fan_in, fan_out):
    """Deterministic PyTorch-Linear-style init: U(-1/sqrt(fan_in), +1/sqrt(fan_in))."""
    kw, kb = jax.random.split(key)
    bound = 1.0 / (fan_in ** 0.5)
    w = jax.random.uniform(kw, (fan_in, fan_out), jnp.float32, -bound, bound)
    b = jax.random.uniform(kb, (fan_out,), jnp.float32, -bound, bound)
    return w, b


def pack_params(params, *, in_channels, compressed_dim):
    """Pack the 16 per-user tensors into one weight slab and one bias slab.

    Weights become block-diagonal (user1 block, user2 block) and are
    zero-padded to (128, 128); biases are zero-padded to (128,).
    """
    (e1w1, e1b1, e1w2, e1b2,
     e2w1, e2b1, e2w2, e2b2,
     d1w1, d1b1, d1w2, d1b2,
     d2w1, d2b1, d2w2, d2b2) = params
    C, D = in_channels, compressed_dim
    assert 2 * C <= LANES and 2 * D <= LANES and C + D <= LANES
    assert 2 * C + 2 * D <= LANES  # activation slab packing fits in one tile

    W = jnp.zeros((4, LANES, LANES), jnp.float32)
    B = jnp.zeros((4, LANES), jnp.float32)

    # encoder layer 1: blockdiag(e1w1 (C,C), e2w1 (C,C))
    W = W.at[0, 0:C, 0:C].set(e1w1).at[0, C:2 * C, C:2 * C].set(e2w1)
    B = B.at[0, 0:C].set(e1b1).at[0, C:2 * C].set(e2b1)
    # encoder layer 2: blockdiag(e1w2 (C,D), e2w2 (C,D))
    W = W.at[1, 0:C, 0:D].set(e1w2).at[1, C:2 * C, D:2 * D].set(e2w2)
    B = B.at[1, 0:D].set(e1b2).at[1, D:2 * D].set(e2b2)
    # decoder layer 1: blockdiag(d1w1 (D,C), d2w1 (D,C))
    W = W.at[2, 0:D, 0:C].set(d1w1).at[2, D:2 * D, C:2 * C].set(d2w1)
    B = B.at[2, 0:C].set(d1b1).at[2, C:2 * C].set(d2b1)
    # decoder layer 2: blockdiag(d1w2 (C,D), d2w2 (C,C))
    W = W.at[3, 0:C, 0:D].set(d1w2).at[3, C:2 * C, D:D + C].set(d2w2)
    B = B.at[3, 0:D].set(d1b2).at[3, D:D + C].set(d2b2)
    return W, B


def rtn_forward(x1, x2, noise1, noise2, w_slab, b_slab, *,
                in_channels, compressed_dim):
    C, D = in_channels, compressed_dim
    batch = x1.shape[0]

    # Batch tiling: TB rows per grid step (multiple of 8 for sublane layout;
    # capped at 256 to match the v6e/v7x MXU pass and stay far under the v7x
    # 64 MiB VMEM budget).  Weights/biases stay VMEM-resident across steps.
    TB = min(256, _round_up(batch, 8))
    batch_pad = _round_up(batch, TB)

    # Pack activations + noise into one lane-dense (batch_pad, 128) slab.
    act = jnp.zeros((batch_pad, LANES), jnp.float32)
    act = act.at[:batch, 0:C].set(x1)
    act = act.at[:batch, C:2 * C].set(x2)
    act = act.at[:batch, 2 * C:2 * C + D].set(noise1)
    act = act.at[:batch, 2 * C + D:2 * C + 2 * D].set(noise2)

    kernel = functools.partial(
        rtn_kernel, in_channels=C, compressed_dim=D)

    out = pl.pallas_call(
        kernel,
        out_shape=jax.ShapeDtypeStruct((batch_pad, LANES), jnp.float32),
        grid=(batch_pad // TB,),
        in_specs=[
            pl.BlockSpec((TB, LANES), lambda i: (i, 0)),          # activations
            pl.BlockSpec((4, LANES, LANES), lambda i: (0, 0, 0)),  # weights
            pl.BlockSpec((4, LANES), lambda i: (0, 0)),            # biases
        ],
        out_specs=pl.BlockSpec((TB, LANES), lambda i: (i, 0)),
        compiler_params=pltpu.CompilerParams(
            dimension_semantics=("parallel",)),
    )(act, w_slab, b_slab)

    decode1 = out[:batch, 0:D]
    decode2 = out[:batch, D:D + C]
    return decode1, decode2


def rtn_reference(x1, x2, noise1, noise2, params, *, in_channels):
    """Pure-JAX reference mirroring the PyTorch forward (for correctness check)."""
    (e1w1, e1b1, e1w2, e1b2,
     e2w1, e2b1, e2w2, e2b2,
     d1w1, d1b1, d1w2, d1b2,
     d2w1, d2b1, d2w2, d2b2) = params

    def mlp(x, w1, b1, w2, b2):
        return jnp.tanh(x @ w1 + b1) @ w2 + b2

    a1 = mlp(x1, e1w1, e1b1, e1w2, e1b2)
    a2 = mlp(x2, e2w1, e2b1, e2w2, e2b2)
    scale = in_channels ** 0.5
    a1 = scale * a1 / jnp.linalg.norm(a1, axis=-1, keepdims=True)
    a2 = scale * a2 / jnp.linalg.norm(a2, axis=-1, keepdims=True)
    sig1 = a1 + noise1 + a2
    sig2 = a1 + a2 + noise2
    dec1 = mlp(sig1, d1w1, d1b1, d1w2, d1b2)
    dec2 = mlp(sig2, d2w1, d2b1, d2w2, d2b2)
    return dec1, dec2


if __name__ == "__main__":
    batch = 8
    in_channels = 32
    compressed_dim = 16

    root = jax.random.PRNGKey(0)
    keys = jax.random.split(root, 12)

    # encoder1: Linear(C, C) -> Tanh -> Linear(C, D)
    e1w1, e1b1 = make_linear_params(keys[0], in_channels, in_channels)
    e1w2, e1b2 = make_linear_params(keys[1], in_channels, compressed_dim)
    # encoder2: Linear(C, C) -> Tanh -> Linear(C, D)
    e2w1, e2b1 = make_linear_params(keys[2], in_channels, in_channels)
    e2w2, e2b2 = make_linear_params(keys[3], in_channels, compressed_dim)
    # decoder1: Linear(D, C) -> Tanh -> Linear(C, D)
    d1w1, d1b1 = make_linear_params(keys[4], compressed_dim, in_channels)
    d1w2, d1b2 = make_linear_params(keys[5], in_channels, compressed_dim)
    # decoder2: Linear(D, C) -> Tanh -> Linear(C, C)
    d2w1, d2b1 = make_linear_params(keys[6], compressed_dim, in_channels)
    d2w2, d2b2 = make_linear_params(keys[7], in_channels, in_channels)

    params = (
        e1w1, e1b1, e1w2, e1b2,
        e2w1, e2b1, e2w2, e2b2,
        d1w1, d1b1, d1w2, d1b2,
        d2w1, d2b1, d2w2, d2b2,
    )
    w_slab, b_slab = pack_params(
        params, in_channels=in_channels, compressed_dim=compressed_dim)

    # inputs
    x1 = jax.random.normal(keys[8], (batch, in_channels), jnp.float32)
    x2 = jax.random.normal(keys[9], (batch, in_channels), jnp.float32)

    # AWGN: randn(*encoded_shape) / sqrt(2 * R * SNR), encoded shape is (B, D)
    noise_scale = 1.0 / ((2.0 * R * TRAIN_SNR) ** 0.5)
    noise1 = jax.random.normal(
        keys[10], (batch, compressed_dim), jnp.float32) * noise_scale
    noise2 = jax.random.normal(
        keys[11], (batch, compressed_dim), jnp.float32) * noise_scale

    decode1, decode2 = rtn_forward(
        x1, x2, noise1, noise2, w_slab, b_slab,
        in_channels=in_channels, compressed_dim=compressed_dim,
    )
    jax.block_until_ready((decode1, decode2))

    assert decode1.shape == (batch, compressed_dim)
    assert decode2.shape == (batch, in_channels)

    # Correctness check against the pure-JAX reference of the PyTorch forward.
    ref1, ref2 = rtn_reference(
        x1, x2, noise1, noise2, params, in_channels=in_channels)
    np.testing.assert_allclose(np.asarray(decode1), np.asarray(ref1),
                               rtol=1e-4, atol=1e-4)
    np.testing.assert_allclose(np.asarray(decode2), np.asarray(ref2),
                               rtol=1e-4, atol=1e-4)

    print("KERNEL_OK")
</pallas_src>

<mosaic_0001>
module attributes {stable_mosaic.version = 11 : i64} {
  func.func @rtn_kernel(%arg0: i32, %arg1: memref<8x128xf32, #tpu.memory_space<vmem>>, %arg2: memref<4x128x128xf32, #tpu.memory_space<vmem>>, %arg3: memref<4x128xf32, #tpu.memory_space<vmem>>, %arg4: memref<8x128xf32, #tpu.memory_space<vmem>>) attributes {dimension_semantics = [#tpu.dimension_semantics<parallel>], iteration_bounds = array<i64: 1>, scalar_prefetch = 0 : i64, scratch_operands = 0 : i64, tpu.core_type = #tpu.core_type<tc>, window_params = [{transform_indices = @transform_0, window_bounds = array<i64: 8, 128>}, {pipeline_mode = #tpu.pipeline_mode<synchronous>, transform_indices = @transform_1, window_bounds = array<i64: 4, 128, 128>}, {pipeline_mode = #tpu.pipeline_mode<synchronous>, transform_indices = @transform_2, window_bounds = array<i64: 4, 128>}, {transform_indices = @transform_3, window_bounds = array<i64: 8, 128>}]} {
    %c0 = arith.constant 0 : index
    %c0_0 = arith.constant 0 : index
    %0 = vector.load %arg1[%c0, %c0_0] : memref<8x128xf32, #tpu.memory_space<vmem>>, vector<8x128xf32>
    %c0_1 = arith.constant 0 : index
    %c0_2 = arith.constant 0 : index
    %1 = vector.load %arg3[%c0_1, %c0_2] : memref<4x128xf32, #tpu.memory_space<vmem>>, vector<4x128xf32>
    %c0_3 = arith.constant 0 : index
    %c0_4 = arith.constant 0 : index
    %c0_5 = arith.constant 0 : index
    %2 = vector.load %arg2[%c0_3, %c0_4, %c0_5] : memref<4x128x128xf32, #tpu.memory_space<vmem>>, vector<1x128x128xf32>
    %3 = vector.shape_cast %2 : vector<1x128x128xf32> to vector<128x128xf32>
    %cst = arith.constant dense<0.000000e+00> : vector<8x128xf32>
    %4 = tpu.matmul %0, %3, %cst {dimension_numbers = #tpu.dot_dimension_numbers<[1], [0], [0], [1], [0, 0, 1, 1], [], []>} : vector<8x128xf32>, vector<128x128xf32>, vector<8x128xf32> -> vector<8x128xf32>
    %5 = vector.extract_strided_slice %1 {offsets = [0, 0], sizes = [1, 128], strides = [1, 1]} : vector<4x128xf32> to vector<1x128xf32>
    %6 = vector.broadcast %5 : vector<1x128xf32> to vector<8x128xf32>
    %7 = arith.addf %4, %6 : vector<8x128xf32>
    %8 = math.tanh %7 : vector<8x128xf32>
    %c1 = arith.constant 1 : index
    %c0_6 = arith.constant 0 : index
    %c0_7 = arith.constant 0 : index
    %9 = vector.load %arg2[%c1, %c0_6, %c0_7] : memref<4x128x128xf32, #tpu.memory_space<vmem>>, vector<1x128x128xf32>
    %10 = vector.shape_cast %9 : vector<1x128x128xf32> to vector<128x128xf32>
    %cst_8 = arith.constant dense<0.000000e+00> : vector<8x128xf32>
    %11 = tpu.matmul %8, %10, %cst_8 {dimension_numbers = #tpu.dot_dimension_numbers<[1], [0], [0], [1], [0, 0, 1, 1], [], []>} : vector<8x128xf32>, vector<128x128xf32>, vector<8x128xf32> -> vector<8x128xf32>
    %12 = vector.extract_strided_slice %1 {offsets = [1, 0], sizes = [1, 128], strides = [1, 1]} : vector<4x128xf32> to vector<1x128xf32>
    %13 = vector.broadcast %12 : vector<1x128xf32> to vector<8x128xf32>
    %14 = arith.addf %11, %13 : vector<8x128xf32>
    %15 = vector.extract_strided_slice %14 {offsets = [0, 0], sizes = [8, 16], strides = [1, 1]} : vector<8x128xf32> to vector<8x16xf32>
    %16 = vector.extract_strided_slice %14 {offsets = [0, 16], sizes = [8, 16], strides = [1, 1]} : vector<8x128xf32> to vector<8x16xf32>
    %cst_9 = arith.constant 3.200000e+01 : f32
    %cst_10 = arith.constant 5.000000e-01 : f32
    %17 = math.powf %cst_9, %cst_10 : f32
    %18 = arith.mulf %15, %15 : vector<8x16xf32>
    %cst_11 = arith.constant dense<0.000000e+00> : vector<8xf32>
    %19 = vector.multi_reduction <add>, %18, %cst_11 [1] : vector<8x16xf32> to vector<8xf32>
    %20 = vector.shape_cast %19 : vector<8xf32> to vector<8x1xf32>
    %cst_12 = arith.constant 9.99999996E-13 : f32
    %21 = vector.broadcast %cst_12 : f32 to vector<8x1xf32>
    %22 = arith.addf %20, %21 : vector<8x1xf32>
    %23 = math.rsqrt %22 : vector<8x1xf32>
    %24 = arith.mulf %16, %16 : vector<8x16xf32>
    %cst_13 = arith.constant dense<0.000000e+00> : vector<8xf32>
    %25 = vector.multi_reduction <add>, %24, %cst_13 [1] : vector<8x16xf32> to vector<8xf32>
    %26 = vector.shape_cast %25 : vector<8xf32> to vector<8x1xf32>
    %cst_14 = arith.constant 9.99999996E-13 : f32
    %27 = vector.broadcast %cst_14 : f32 to vector<8x1xf32>
    %28 = arith.addf %26, %27 : vector<8x1xf32>
    %29 = math.rsqrt %28 : vector<8x1xf32>
    %30 = vector.broadcast %17 : f32 to vector<8x16xf32>
    %31 = arith.mulf %30, %15 : vector<8x16xf32>
    %32 = vector.broadcast %23 : vector<8x1xf32> to vector<8x16xf32>
    %33 = arith.mulf %31, %32 : vector<8x16xf32>
    %34 = vector.broadcast %17 : f32 to vector<8x16xf32>
    %35 = arith.mulf %34, %16 : vector<8x16xf32>
    %36 = vector.broadcast %29 : vector<8x1xf32> to vector<8x16xf32>
    %37 = arith.mulf %35, %36 : vector<8x16xf32>
    %38 = vector.extract_strided_slice %0 {offsets = [0, 64], sizes = [8, 16], strides = [1, 1]} : vector<8x128xf32> to vector<8x16xf32>
    %39 = vector.extract_strided_slice %0 {offsets = [0, 80], sizes = [8, 16], strides = [1, 1]} : vector<8x128xf32> to vector<8x16xf32>
    %40 = arith.addf %33, %37 : vector<8x16xf32>
    %41 = arith.addf %40, %38 : vector<8x16xf32>
    %42 = arith.addf %40, %39 : vector<8x16xf32>
    %cst_15 = arith.constant 0.000000e+00 : f32
    %43 = vector.broadcast %cst_15 : f32 to vector<8x96xf32>
    %44 = tpu.concatenate %41, %42, %43 in 1 : vector<8x16xf32>, vector<8x16xf32>, vector<8x96xf32> -> vector<8x128xf32>
    %c2 = arith.constant 2 : index
    %c0_16 = arith.constant 0 : index
    %c0_17 = arith.constant 0 : index
    %45 = vector.load %arg2[%c2, %c0_16, %c0_17] : memref<4x128x128xf32, #tpu.memory_space<vmem>>, vector<1x128x128xf32>
    %46 = vector.shape_cast %45 : vector<1x128x128xf32> to vector<128x128xf32>
    %cst_18 = arith.constant dense<0.000000e+00> : vector<8x128xf32>
    %47 = tpu.matmul %44, %46, %cst_18 {dimension_numbers = #tpu.dot_dimension_numbers<[1], [0], [0], [1], [0, 0, 1, 1], [], []>} : vector<8x128xf32>, vector<128x128xf32>, vector<8x128xf32> -> vector<8x128xf32>
    %48 = vector.extract_strided_slice %1 {offsets = [2, 0], sizes = [1, 128], strides = [1, 1]} : vector<4x128xf32> to vector<1x128xf32>
    %49 = vector.broadcast %48 : vector<1x128xf32> to vector<8x128xf32>
    %50 = arith.addf %47, %49 : vector<8x128xf32>
    %51 = math.tanh %50 : vector<8x128xf32>
    %c3 = arith.constant 3 : index
    %c0_19 = arith.constant 0 : index
    %c0_20 = arith.constant 0 : index
    %52 = vector.load %arg2[%c3, %c0_19, %c0_20] : memref<4x128x128xf32, #tpu.memory_space<vmem>>, vector<1x128x128xf32>
    %53 = vector.shape_cast %52 : vector<1x128x128xf32> to vector<128x128xf32>
    %cst_21 = arith.constant dense<0.000000e+00> : vector<8x128xf32>
    %54 = tpu.matmul %51, %53, %cst_21 {dimension_numbers = #tpu.dot_dimension_numbers<[1], [0], [0], [1], [0, 0, 1, 1], [], []>} : vector<8x128xf32>, vector<128x128xf32>, vector<8x128xf32> -> vector<8x128xf32>
    %55 = vector.extract_strided_slice %1 {offsets = [3, 0], sizes = [1, 128], strides = [1, 1]} : vector<4x128xf32> to vector<1x128xf32>
    %56 = vector.broadcast %55 : vector<1x128xf32> to vector<8x128xf32>
    %57 = arith.addf %54, %56 : vector<8x128xf32>
    %c0_22 = arith.constant 0 : index
    %c0_23 = arith.constant 0 : index
    %58 = vector.load %arg4[%c0_22, %c0_23] : memref<8x128xf32, #tpu.memory_space<vmem>>, vector<8x128xf32>
    tpu.vector_store %arg4[%c0_22, %c0_23], %57 {strides = array<i32>} : memref<8x128xf32, #tpu.memory_space<vmem>>, vector<8x128xf32>,
    return
  }
  func.func @transform_0(%arg0: i32) -> (i32, i32) {
    %c0_i32 = arith.constant 0 : i32
    %c0_i32_0 = arith.constant 0 : i32
    return %arg0, %c0_i32 : i32, i32
  }
  func.func @transform_1(%arg0: i32) -> (i32, i32, i32) {
    %c0_i32 = arith.constant 0 : i32
    %c0_i32_0 = arith.constant 0 : i32
    %c0_i32_1 = arith.constant 0 : i32
    %c0_i32_2 = arith.constant 0 : i32
    return %c0_i32, %c0_i32_0, %c0_i32_1 : i32, i32, i32
  }
  func.func @transform_2(%arg0: i32) -> (i32, i32) {
    %c0_i32 = arith.constant 0 : i32
    %c0_i32_0 = arith.constant 0 : i32
    %c0_i32_1 = arith.constant 0 : i32
    return %c0_i32, %c0_i32_0 : i32, i32
  }
  func.func @transform_3(%arg0: i32) -> (i32, i32) {
    %c0_i32 = arith.constant 0 : i32
    %c0_i32_0 = arith.constant 0 : i32
    return %arg0, %c0_i32 : i32, i32
  }
}

</mosaic_0001>

<bundles_post_ra>
// kernel: tpu_custom_call.1
= control target key start
LH: loop header
LB: loop body
LE: loop exit
PB: predicated region body
PF: predicated region fallthrough
CT: control target
= control target key end

     0   :  { %8 = vsyncpa [#allocation3], 0  ;;  %s1000_s0 = inlined_call_operand.hbm [shape: f32[8,128], index: 0, kind: input, shape index: {}]   ;;  %s1001_s1 = inlined_call_operand.hbm [shape: f32[4,128,128], index: 1, kind: input, shape index: {}]   ;;  %s1002_s2 = inlined_call_operand.vmem [shape: f32[4,128], index: 2, kind: input, shape index: {}]   ;;  %s1003_s3 = inlined_call_operand.hbm [shape: f32[8,128], index: 3, kind: output, shape index: {}]  }
   0x1   :  { %9 = vsyncpa [#allocation6], 0 }
   0x2   :  { %10 = vsyncpa [#allocation4], 0  ;;  %s862_s12 = smov [#allocation2]   ;;  %s863_s14 = smov [#allocation5]  }
   0x3   :  { %s17_s13 = sshll.u32 %s862_s12, 4  ;;  %s26_s15 = sshll.u32 %s863_s14, 4  ;;  %s18_s13 = int_to_ptr.vmem [resolvable:$true] %s17_s13  ;;  %s894_s15 = int_to_ptr.vmem [resolvable:$true] %s26_s15 }
   0x4   :  { %s790_s18 = scalar_lea.hbm %s1000_s0, 128 }
   0x5   :  { %p791_p0 = scmp.ne.s32.totalorder %s1000_s0, %s790_s18  ;;  %p794_p1 = scmp.lt.u32.totalorder %s790_s18, %s1000_s0 }
   0x7   :  { %p796_p2 = pnand %p794_p1, %p791_p0 }
   0x9   :  { %799 = shalt.err (!%p796_p2)
}
   0xa   :  { %s800_s23 = scalar_lea.vmem %s18_s13, 128  ;;  %p805_p4 = scmp.lt.s32.totalorder %s18_s13, %s18_s13 }
   0xb   :  { %p801_p3 = scmp.ne.s32.totalorder %s18_s13, %s800_s23  ;;  %p806_p5 = scmp.lt.s32.totalorder %s800_s23, %s800_s23 }
   0xd   :  { %p807_p6 = por %p806_p5, %p805_p4 }
   0xf   :  { %p808_p7 = pnand %p807_p6, %p801_p3 }
  0x11   :  { %811 = shalt.err (!%p808_p7)
}
  0x12   :  { %20 = dma.hbm_to_vmem [thread:$0]  %s1000_s0, 128, %s18_s13, [#allocation3]  }
  0x13   :  { %s812_s28 = scalar_lea.hbm %s1001_s1, 8192 }
  0x14   :  { %p813_p8 = scmp.ne.s32.totalorder %s1001_s1, %s812_s28  ;;  %p816_p9 = scmp.lt.u32.totalorder %s812_s28, %s1001_s1 }
  0x16   :  { %p818_p10 = pnand %p816_p9, %p813_p8 }
  0x18   :  { %821 = shalt.err (!%p818_p10)
}
  0x19   :  { %s822_s6 = scalar_lea.vmem %s894_s15, 8192  ;;  %p827_p12 = scmp.lt.s32.totalorder %s894_s15, %s894_s15 }
  0x1a   :  { %p823_p11 = scmp.ne.s32.totalorder %s894_s15, %s822_s6  ;;  %p828_p13 = scmp.lt.s32.totalorder %s822_s6, %s822_s6 }
  0x1c   :  { %p829_p0 = por %p828_p13, %p827_p12 }
  0x1e   :  { %p830_p1 = pnand %p829_p0, %p823_p11 }
  0x20   :  { %833 = shalt.err (!%p830_p1)
}
  0x21   :  { %s864_s0 = smov 128   ;;  %s865_s7 = smov 8  }
  0x22   :  { %32 = dma.hbm_to_vmem [thread:$0]  %s1001_s1, 8192, %s894_s15, [#allocation6], %s864_s0, %s864_s0, %s865_s7  }
  0x23   :  { %856 = dma.done.wait [#allocation3], 128  }
  0x24   :  { %857 = vsyncadd [#allocation3], 4294967168 }
  0x25   :  { %858 = dma.done.wait [#allocation6], 8192  }
  0x26   :  { %859 = vsyncadd [#allocation6], 4294959104  ;;  %v866_v0 = vmov 0.0|0.0   ;;  %vm867_vm0 = vmmov 0   ;;  %v868_v1 = vmov 0.0   ;;  %v43_v2 = vld [vmem:[#allocation5] sm:$0xff]  ;;  %v59_v51 = vlaneseq }
  0x27   :  { %674 = vmatprep.subr.bf16.mxu0 %v866_v0  ;;  %566 = vmatprep.mubr.msk.f32.mxu0 %vm867_vm0, %v868_v1  ;;  %v44_v3 = vld [vmem:[#allocation5 + $0x8] sm:$0xff]  ;;  %v45_v4 = vld [vmem:[#allocation5 + $0x10] sm:$0xff]  ;;  %v46_v6 = vld [vmem:[#allocation5 + $0x18] sm:$0xff]  ;;  %vm226_vm1 = vcmask 130048   ;;  %s870_s11 = smov 48   ;;  %s871_s12 = smov 64  }
  0x28   :  { %698 = vmatprep.subr.bf16.mxu1 %v866_v0  ;;  %601 = vmatprep.mubr.msk.f32.mxu1 %vm867_vm0, %v868_v1  ;;  %v675_v5 = vpack.c.bf16 %v44_v3, %v43_v2  ;;  %v678_v7 = vpack.c.bf16 %v46_v6, %v45_v4  ;;  %v47_v8 = vld [vmem:[#allocation5 + $0x20] sm:$0xff]  ;;  %v48_v9 = vld [vmem:[#allocation5 + $0x28] sm:$0xff]  ;;  %v137_v12 = vld [vmem:[#allocation5 + $0x90] sm:$0xff]  ;;  %v952_v52 = vshrl.u32 %v59_v51, 7  ;;  %s872_s13 = smov 16   ;;  %vm263_vm2 = vcmask 261120  }
  0x29   :  { %v135_v10 = vld [vmem:[#allocation5 + $0x80] sm:$0xff]  ;;  %v136_v11 = vld [vmem:[#allocation5 + $0x88] sm:$0xff]  ;;  %v138_v13 = vld [vmem:[#allocation5 + $0x98] sm:$0xff]  ;;  %v681_v14 = vpack.c.bf16 %v48_v9, %v47_v8  ;;  %s873_s14 = smov [#allocation7]  }
  0x2a   :  { %676 = vmatpush3.bf16.msra.mxu0 %v675_v5  ;;  %v699_v15 = vpack.c.bf16 %v136_v11, %v135_v10  ;;  %v49_v16 = vld [vmem:[#allocation5 + $0x30] sm:$0xff]  ;;  %v50_v17 = vld [vmem:[#allocation5 + $0x38] sm:$0xff]  ;;  %v702_v18 = vpack.c.bf16 %v138_v13, %v137_v12  ;;  %v139_v19 = vld [vmem:[#allocation5 + $0xa0] sm:$0xff]  ;;  %v61_v53 = vsub.s32 0, %v952_v52  ;;  %v153_v60 = vsub.s32 1, %v952_v52  ;;  %s455_s15 = sshll.u32 %s873_s14, 4  ;;  %s456_s15 = int_to_ptr.vmem [resolvable:$true] %s455_s15 }
  0x2b   :  { %677 = vmatprep.subr.bf16.mxu0 %v866_v0  ;;  %v140_v20 = vld [vmem:[#allocation5 + $0xa8] sm:$0xff]  ;;  %v684_v21 = vpack.c.bf16 %v50_v17, %v49_v16  ;;  %v51_v22 = vld [vmem:[#allocation5 + $0x40] sm:$0xff]  ;;  %v141_v25 = vld [vmem:[#allocation5 + $0xb0] sm:$0xff]  ;;  %s834_s16 = scalar_lea.vmem %s456_s15, 128  ;;  %p839_p3 = scmp.lt.s32.totalorder %s456_s15, %s456_s15 }
  0x2c   :  { %700 = vmatpush3.bf16.msra.mxu1 %v699_v15  ;;  %v52_v23 = vld [vmem:[#allocation5 + $0x48] sm:$0xff]  ;;  %v705_v24 = vpack.c.bf16 %v140_v20, %v139_v19  ;;  %v142_v26 = vld [vmem:[#allocation5 + $0xb8] sm:$0xff]  ;;  %v53_v28 = vld [vmem:[#allocation5 + $0x50] sm:$0xff]  ;;  %p835_p2 = scmp.ne.s32.totalorder %s456_s15, %s834_s16  ;;  %p840_p4 = scmp.lt.s32.totalorder %s834_s16, %s834_s16 }
  0x2d   :  { %701 = vmatprep.subr.bf16.mxu1 %v866_v0  ;;  %v687_v27 = vpack.c.bf16 %v52_v23, %v51_v22  ;;  %v54_v29 = vld [vmem:[#allocation5 + $0x58] sm:$0xff]  ;;  %v708_v30 = vpack.c.bf16 %v142_v26, %v141_v25  ;;  %v143_v31 = vld [vmem:[#allocation5 + $0xc0] sm:$0xff]  ;;  %v144_v32 = vld [vmem:[#allocation5 + $0xc8] sm:$0xff] }
  0x2e   :  { %679 = vmatpush3.bf16.msra.mxu0 %v678_v7  ;;  %v690_v33 = vpack.c.bf16 %v54_v29, %v53_v28  ;;  %v55_v34 = vld [vmem:[#allocation5 + $0x60] sm:$0xff]  ;;  %v56_v35 = vld [vmem:[#allocation5 + $0x68] sm:$0xff]  ;;  %v711_v36 = vpack.c.bf16 %v144_v32, %v143_v31  ;;  %v57_v38 = vld [vmem:[#allocation5 + $0x70] sm:$0xff]  ;;  %p841_p5 = por %p840_p4, %p839_p3 }
  0x2f   :  { %680 = vmatprep.subr.bf16.mxu0 %v866_v0  ;;  %v693_v37 = vpack.c.bf16 %v56_v35, %v55_v34  ;;  %v58_v39 = vld [vmem:[#allocation5 + $0x78] sm:$0xff]  ;;  %v145_v42 = vld [vmem:[#allocation5 + $0xd0] sm:$0xff]  ;;  %v147_v45 = vld [vmem:[#allocation5 + $0xe0] sm:$0xff] }
  0x30   :  { %703 = vmatpush3.bf16.msra.mxu1 %v702_v18  ;;  %v696_v40 = vpack.c.bf16 %v58_v39, %v57_v38  ;;  %v943_v41 = vld [vmem:[#allocation2] sm:$0xff]  ;;  %v148_v46 = vld [vmem:[#allocation5 + $0xe8] sm:$0xff]  ;;  %v149_v48 = vld [vmem:[#allocation5 + $0xf0] sm:$0xff]  ;;  %p842_p6 = pnand %p841_p5, %p835_p2 }
  0x31   :  { %704 = vmatprep.subr.bf16.mxu1 %v866_v0  ;;  %v146_v43 = vld [vmem:[#allocation5 + $0xd8] sm:$0xff]  ;;  %v717_v47 = vpack.c.bf16 %v148_v46, %v147_v45  ;;  %v266_v8 = vld [vmem:[#allocation5 + $0x100] sm:$0xff]  ;;  %v267_v9 = vld [vmem:[#allocation5 + $0x108] sm:$0xff] }
  0x32   :  { %682 = vmatpush3.bf16.msra.mxu0 %v681_v14  ;;  %v714_v44 = vpack.c.bf16 %v146_v43, %v145_v42  ;;  %v150_v49 = vld [vmem:[#allocation5 + $0xf8] sm:$0xff]  ;;  %v268_v10 = vld [vmem:[#allocation5 + $0x110] sm:$0xff]  ;;  %v723_v12 = vpack.c.bf16 %v267_v9, %v266_v8  ;;  %v270_v17 = vld [vmem:[#allocation5 + $0x120] sm:$0xff] }
  0x33   :  { %683 = vmatprep.subr.bf16.mxu0 %v866_v0  ;;  %v720_v50 = vpack.c.bf16 %v150_v49, %v149_v48  ;;  %v958_v54 = vld [vmem:[%s1002_s2] sm:$0xf]  ;;  %s869_s2 = smov 112   ;;  %v271_v18 = vld [vmem:[#allocation5 + $0x128] sm:$0xff]  ;;  %v272_v20 = vld [vmem:[#allocation5 + $0x130] sm:$0xff] }
  0x34   :  { %706 = vmatpush3.bf16.msra.mxu1 %v705_v24  ;;  %v62_v55 = vrot.slane %v958_v54, %v61_v53  ;;  %v154_v61 = vrot.slane %v958_v54, %v153_v60  ;;  %v269_v13 = vld [vmem:[#allocation5 + $0x118] sm:$0xff]  ;;  %v729_v19 = vpack.c.bf16 %v271_v18, %v270_v17  ;;  %v274_v23 = vld [vmem:[#allocation5 + $0x140] sm:$0xff]  ;;  %v275_v24 = vld [vmem:[#allocation5 + $0x148] sm:$0xff] }
  0x35   :  { %707 = vmatprep.subr.bf16.mxu1 %v866_v0  ;;  %v726_v16 = vpack.c.bf16 %v269_v13, %v268_v10  ;;  %v735_v25 = vpack.c.bf16 %v275_v24, %v274_v23  ;;  %v276_v26 = vld [vmem:[#allocation5 + $0x150] sm:$0xff]  ;;  %v278_v29 = vld [vmem:[#allocation5 + $0x160] sm:$0xff]  ;;  %v359_v38 = vld [vmem:[#allocation5 + $0x188] sm:$0xff]  ;;  %v284_v10 = vsub.s32 2, %v952_v52 }
  0x36   :  { %685 = vmatpush3.bf16.msra.mxu0 %v684_v21  ;;  %v273_v21 = vld [vmem:[#allocation5 + $0x138] sm:$0xff]  ;;  %v280_v32 = vld [vmem:[#allocation5 + $0x170] sm:$0xff]  ;;  %v363_v45 = vld [vmem:[#allocation5 + $0x1a8] sm:$0xff] }
  0x37   :  { %686 = vmatprep.subr.bf16.mxu0 %v866_v0  ;;  %v732_v22 = vpack.c.bf16 %v273_v21, %v272_v20  ;;  %v360_v39 = vld [vmem:[#allocation5 + $0x190] sm:$0xff]  ;;  %v365_v51 = vld [vmem:[#allocation5 + $0x1b8] sm:$0xff] }
  0x38   :  { %709 = vmatpush3.bf16.msra.mxu1 %v708_v30  ;;  %v279_v30 = vld [vmem:[#allocation5 + $0x168] sm:$0xff]  ;;  %v373_v8 = vld [vmem:[#allocation5 + $0x1f8] sm:$0xff] }
  0x39   :  { %710 = vmatprep.subr.bf16.mxu1 %v866_v0  ;;  %v741_v31 = vpack.c.bf16 %v279_v30, %v278_v29 }
  0x3a   :  { %688 = vmatpush3.bf16.msra.mxu0 %v687_v27  ;;  %v277_v27 = vld [vmem:[#allocation5 + $0x158] sm:$0xff] }
  0x3b   :  { %689 = vmatprep.subr.bf16.mxu0 %v866_v0  ;;  %v738_v28 = vpack.c.bf16 %v277_v27, %v276_v26 }
  0x3c   :  { %712 = vmatpush3.bf16.msra.mxu1 %v711_v36 }
  0x3d   :  { %713 = vmatprep.subr.bf16.mxu1 %v866_v0 }
  0x3e   :  { %691 = vmatpush3.bf16.msra.mxu0 %v690_v33  ;;  %v281_v33 = vld [vmem:[#allocation5 + $0x178] sm:$0xff] }
  0x3f   :  { %692 = vmatprep.subr.bf16.mxu0 %v866_v0  ;;  %v744_v34 = vpack.c.bf16 %v281_v33, %v280_v32 }
  0x40   :  { %715 = vmatpush3.bf16.msra.mxu1 %v714_v44  ;;  %v362_v44 = vld [vmem:[#allocation5 + $0x1a0] sm:$0xff] }
  0x41   :  { %716 = vmatprep.subr.bf16.mxu1 %v866_v0  ;;  %v753_v48 = vpack.c.bf16 %v363_v45, %v362_v44 }
  0x42   :  { %694 = vmatpush3.bf16.msra.mxu0 %v693_v37  ;;  %v358_v37 = vld [vmem:[#allocation5 + $0x180] sm:$0xff] }
  0x43   :  { %695 = vmatprep.subr.bf16.mxu0 %v866_v0 }
  0x44   :  { %718 = vmatpush3.bf16.msra.mxu1 %v717_v47 }
  0x45   :  { %719 = vmatprep.subr.bf16.mxu1 %v866_v0 }
  0x46   :  { %697 = vmatpush3.bf16.msra.mxu0 %v696_v40  ;;  %v747_v40 = vpack.c.bf16 %v359_v38, %v358_v37 }
  0x47   :  { %722 = vmatprep.subr.bf16.mxu0 %v866_v0 }
  0x48   :  { %721 = vmatpush3.bf16.msra.mxu1 %v720_v50  ;;  %v364_v50 = vld [vmem:[#allocation5 + $0x1b0] sm:$0xff] }
  0x49   :  { %567 = vmatmul.mubr.f32.vlgmr.msra.gmra.mrb[0].mxu0 %v943_v41  ;;  %746 = vmatprep.subr.bf16.mxu1 %v866_v0 }
  0x4a   :  { %636 = vmatprep.mubr.msk.f32.mxu0 %vm867_vm0, %v868_v1  ;;  %724 = vmatpush3.bf16.msra.mxu0 %v723_v12 }
  0x4b   :  { %725 = vmatprep.subr.bf16.mxu0 %v866_v0 }
  0x4e   :  { %727 = vmatpush3.bf16.msra.mxu0 %v726_v16  ;;  %v376_v16 = vsub.s32 3, %v952_v52 }
  0x4f   :  { %728 = vmatprep.subr.bf16.mxu0 %v866_v0 }
  0x50   :  { %v377_v17 = vrot.slane %v958_v54, %v376_v16 }
  0x52   :  { %730 = vmatpush3.bf16.msra.mxu0 %v729_v19 }
  0x53   :  { %731 = vmatprep.subr.bf16.mxu0 %v866_v0 }
  0x56   :  { %733 = vmatpush3.bf16.msra.mxu0 %v732_v22 }
  0x57   :  { %734 = vmatprep.subr.bf16.mxu0 %v866_v0 }
  0x5a   :  { %736 = vmatpush3.bf16.msra.mxu0 %v735_v25 }
  0x5b   :  { %737 = vmatprep.subr.bf16.mxu0 %v866_v0 }
  0x5e   :  { %739 = vmatpush3.bf16.msra.mxu0 %v738_v28 }
  0x5f   :  { %740 = vmatprep.subr.bf16.mxu0 %v866_v0 }
  0x62   :  { %742 = vmatpush3.bf16.msra.mxu0 %v741_v31 }
  0x63   :  { %743 = vmatprep.subr.bf16.mxu0 %v866_v0 }
  0x66   :  { %745 = vmatpush3.bf16.msra.mxu0 %v744_v34 }
 0x11c   :  { %v129_v56 = vpop.f32.mrb[0].mxu0 }
 0x11d   :  { %v130_v57 = vadd.f32 %v129_v56, %v62_v55  ;;  %v568_v58 = vpop.f32.mrb[1].mxu0  ;;  %v756_v56 = vpack.c.bf16 %v365_v51, %v364_v50 }
 0x11e   :  { %v367_v58 = vld [vmem:[#allocation5 + $0x1c8] sm:$0xff] }
 0x11f   :  { %782 = vtanh.f32 %v130_v57  ;;  %v366_v57 = vld [vmem:[#allocation5 + $0x1c0] sm:$0xff] }
 0x129   :  { %v783_v59 = vpop.eup %782 }
 0x12a   :  { %602 = vmatmul.mubr.f32.vlgmr.msra.gmra.mrb[0].mxu1 %v783_v59  ;;  %v759_v59 = vpack.c.bf16 %v367_v58, %v366_v57 }
 0x12b   :  { %671 = vmatprep.mubr.msk.f32.mxu1 %vm867_vm0, %v868_v1  ;;  %748 = vmatpush3.bf16.msra.mxu1 %v747_v40 }
 0x12c   :  { %749 = vmatprep.subr.bf16.mxu1 %v866_v0 }
 0x1fd   :  { %v221_v62 = vpop.f32.mrb[0].mxu1 }
 0x1fe   :  { %v222_v63 = vadd.f32 %v221_v62, %v154_v61  ;;  %v603_v2 = vpop.f32.mrb[1].mxu1 }
 0x1ff   :  { %v368_v2 = vld [vmem:[#allocation5 + $0x1d0] sm:$0xff] }
 0x200   :  { %v225_v3 = vmul.f32 %v222_v63, %v222_v63  ;;  %v241_v11 = vmul.f32 5.656854, %v222_v63 }
 0x202   :  { %233 = vrot.lane.b32.xlu0 %v225_v3, %s869_s2  ;;  %v227_v4 = vsel %vm226_vm1, %v225_v3, 0.0  ;;  %v369_v3 = vld [vmem:[#allocation5 + $0x1d8] sm:$0xff] }
 0x203   :  { %228 = vadd.xlane.f32.xlu1 %v227_v4  ;;  %v762_v4 = vpack.c.bf16 %v369_v3, %v368_v2 }
 0x274   :  { %v234_v5 = vpop.permute.xlu0 %233 }
 0x275   :  { %v236_v6 = vsel %vm226_vm1, %v234_v5, 0.0  ;;  %v370_v5 = vld [vmem:[#allocation5 + $0x1e0] sm:$0xff] }
 0x276   :  { %237 = vadd.xlane.f32.xlu0 %v236_v6  ;;  %v371_v6 = vld [vmem:[#allocation5 + $0x1e8] sm:$0xff] }
 0x290   :  { %v229_v35 = vpop.xlane.xlu1 %228 }
 0x291   :  { %v230_v36 = vadd.f32 1e-12, %v229_v35 }
 0x303   :  { %v238_v7 = vpop.xlane.xlu0 %237 }
 0x304   :  { %v239_v1 = vadd.f32 1e-12, %v238_v7  ;;  %v765_v7 = vpack.c.bf16 %v371_v6, %v370_v5 }
 0x306   :  { %784 = vrsqrt.f32 %v239_v1  ;;  %v372_v1 = vld [vmem:[#allocation5 + $0x1f0] sm:$0xff] }
 0x307   :  { %786 = vrsqrt.f32 %v230_v36  ;;  %v768_v9 = vpack.c.bf16 %v373_v8, %v372_v1 }
 0x310   :  { %v785_v14 = vpop.eup %784 }
 0x311   :  { %v243_v15 = vmul.f32 %v785_v14, %v241_v11  ;;  %v787_v42 = vpop.eup %786 }
 0x312   :  { %v242_v47 = vmul.f32 %v787_v42, %v241_v11  ;;  %v285_v11 = vrot.slane %v958_v54, %v284_v10 }
 0x313   :  { %245 = vrot.lane.b32.xlu1 %v243_v15, %s869_s2 }
 0x317   :  { %254 = vrot.lane.b32.xlu1 %v943_v41, %s870_s11 }
 0x31b   :  { %250 = vrot.lane.b32.xlu1 %v943_v41, %s871_s12  ;;  %v361_v41 = vld [vmem:[#allocation5 + $0x198] sm:$0xff] }
 0x31c   :  { %v750_v43 = vpack.c.bf16 %v361_v41, %v360_v39 }
 0x31e   :  { %751 = vmatpush3.bf16.msra.mxu1 %v750_v43 }
 0x31f   :  { %752 = vmatprep.subr.bf16.mxu1 %v866_v0 }
 0x322   :  { %754 = vmatpush3.bf16.msra.mxu1 %v753_v48 }
 0x323   :  { %755 = vmatprep.subr.bf16.mxu1 %v866_v0 }
 0x326   :  { %757 = vmatpush3.bf16.msra.mxu1 %v756_v56 }
 0x327   :  { %758 = vmatprep.subr.bf16.mxu1 %v866_v0 }
 0x32a   :  { %760 = vmatpush3.bf16.msra.mxu1 %v759_v59 }
 0x32b   :  { %761 = vmatprep.subr.bf16.mxu1 %v866_v0 }
 0x32e   :  { %763 = vmatpush3.bf16.msra.mxu1 %v762_v4 }
 0x32f   :  { %764 = vmatprep.subr.bf16.mxu1 %v866_v0 }
 0x332   :  { %766 = vmatpush3.bf16.msra.mxu1 %v765_v7 }
 0x333   :  { %767 = vmatprep.subr.bf16.mxu1 %v866_v0 }
 0x336   :  { %769 = vmatpush3.bf16.msra.mxu1 %v768_v9 }
 0x385   :  { %v246_v46 = vpop.permute.xlu1 %245 }
 0x386   :  { %v248_v49 = vadd.f32 %v246_v46, %v242_v47 }
 0x389   :  { %v255_v53 = vpop.permute.xlu1 %254 }
 0x38a   :  { %v257_v55 = vadd.f32 %v255_v53, %v248_v49 }
 0x38c   :  { %259 = vrot.lane.b32.xlu1 %v257_v55, %s872_s13 }
 0x38d   :  { %v251_v60 = vpop.permute.xlu1 %250 }
 0x38e   :  { %v253_v61 = vadd.f32 %v251_v60, %v248_v49 }
 0x3fe   :  { %v260_v62 = vpop.permute.xlu1 %259 }
 0x3ff   :  { %v262_v63 = vsel %vm226_vm1, %v253_v61, %v260_v62 }
 0x400   :  { %637 = vmatmul.mubr.msk.f32.vlgmr.msra.gmra.mrb[2].mxu0 %vm263_vm2, %v262_v63 }
 0x4d3   :  { %v352_v12 = vpop.f32.mrb[2].mxu0 }
 0x4d4   :  { %v353_v13 = vadd.f32 %v352_v12, %v285_v11  ;;  %v638_v14 = vpop.f32.mrb[3].mxu0 }
 0x4d6   :  { %788 = vtanh.f32 %v353_v13 }
 0x4e0   :  { %v789_v15 = vpop.eup %788 }
 0x4e1   :  { %672 = vmatmul.mubr.f32.vlgmr.msra.gmra.mrb[2].mxu1 %v789_v15 }
 0x5b4   :  { %v444_v18 = vpop.f32.mrb[2].mxu1 }
 0x5b5   :  { %v445_v19 = vadd.f32 %v444_v18, %v377_v17  ;;  %v673_v0 = vpop.f32.mrb[3].mxu1 }
 0x5b7   :  { %448 = vst [vmem:[#allocation7] sm:$0xff] %v445_v19 }
 0x5b8   :  { %845 = shalt.err (!%p842_p6)
}
 0x5b9   :  { %s846_s19 = scalar_lea.hbm %s1003_s3, 128 }
 0x5ba   :  { %p847_p7 = scmp.ne.s32.totalorder %s1003_s3, %s846_s19  ;;  %p850_p8 = scmp.lt.u32.totalorder %s846_s19, %s1003_s3 }
 0x5bc   :  { %p852_p9 = pnand %p850_p8, %p847_p7 }
 0x5be   :  { %855 = shalt.err (!%p852_p9)
}
 0x5bf   :  { %458 = dma.vmem_to_hbm [thread:$0]  %s456_s15, 128, %s1003_s3, [#allocation4]  }
 0x5c0   :  { %860 = dma.done.wait [#allocation4], 128  }
 0x5c1   :  { %861 = vsyncadd [#allocation4], 4294967168 }
 0x5c2   :  { %462 = vsyncpa [#allocation3], 1 }
 0x5c3   :  { %463 = vsyncpa [#allocation6], 1 }
 0x5c4   :  { %464 = vsyncpa [#allocation4], 1 }

</bundles_post_ra>
